<compile_context>
chip_gen: v7x
topology: tpu7x:2x2x1
jax: 0.10.0
libtpu: 0.0.40
codegen_flags: <defaults>
</compile_context>

<pallas_src>
import jax
import jax.numpy as jnp
import numpy as np
from jax.experimental import pallas as pl
from jax.experimental.pallas import tpu as pltpu


def _linear_kernel(b_ref, x_ref, w_ref, o_ref):
    # b_ref: (1,) SMEM scalar (prefetched)
    # x_ref: (TILE_B, D) VMEM; w_ref: (1, D) VMEM (resident, constant index_map)
    # o_ref: (1, 1, TILE_B) VMEM — lane-dense output row for this batch tile.
    #
    # VPU broadcast-multiply + lane-axis reduce; the 1-D result is lane-major,
    # so the store is a handful of wide vst ops instead of TILE_B/8 masked ones.
    # TODO(synk): for very wide D, fold (TILE_B, D//128, 128) on the VPU first
    # (single cross-lane reduce at the end) and/or add a trailing "arbitrary"
    # K grid axis with an f32 accumulator so tiles still fit v7x's 64 MiB VMEM.
    acc = jnp.sum(x_ref[...] * w_ref[...], axis=1)              # (TILE_B,) f32
    o_ref[0, 0, :] = (acc + b_ref[0]).astype(o_ref.dtype)


def _pick_tile_b(batch, width):
    """Largest batch tile (multiple of 8) with ~8 MiB of x per pipeline buffer."""
    budget = 8 * 1024 * 1024                   # bytes of x per pipeline buffer stage
    per_row = width * 4 + 32                   # f32 x row + out lane (1/8-dense (1,·) tile)
    tile = budget // max(per_row, 1)
    tile = max(8, min(tile, 65536))            # keep the out row's lane extent sane
    tile = min(tile, ((batch + 7) // 8) * 8)   # never tile past the (8-rounded) batch
    tile = max(8, (tile // 8) * 8)             # multiple of 8 sublanes
    return tile


def linear_model_forward(x, weight, bias):
    """x: (B, D) f32; weight: (1, D) f32; bias: (1,) f32 -> (B, 1) f32."""
    B, D = x.shape
    tile_b = _pick_tile_b(B, D)
    num_tiles = pl.cdiv(B, tile_b)             # ragged last block handled by Pallas

    bias1 = bias.reshape(1).astype(jnp.float32)   # SMEM scalar via prefetch

    out = pl.pallas_call(
        _linear_kernel,
        out_shape=jax.ShapeDtypeStruct((num_tiles, 1, tile_b), x.dtype),
        grid_spec=pltpu.PrefetchScalarGridSpec(
            num_scalar_prefetch=1,
            grid=(num_tiles,),
            in_specs=[
                pl.BlockSpec((tile_b, D), lambda i, b: (i, 0)),   # x tile (streamed)
                pl.BlockSpec((1, D), lambda i, b: (0, 0)),        # weight row (resident)
            ],
            out_specs=pl.BlockSpec((1, 1, tile_b), lambda i, b: (i, 0, 0)),
        ),
        compiler_params=pltpu.CompilerParams(
            dimension_semantics=("parallel",),     # shard batch tiles across TCs (v7x)
            vmem_limit_bytes=32 * 1024 * 1024,     # large tile also fits v5e scoped VMEM
        ),
        cost_estimate=pl.CostEstimate(
            flops=2 * B * D,
            transcendentals=0,
            bytes_accessed=4 * (B * D + D + B),
        ),
    )(bias1, x, weight)

    # (num_tiles, 1, tile_b) lane-major rows -> (B, 1); over-hang rows dropped.
    return out.reshape(-1)[:B].reshape(B, 1)


def init_params(width, key):
    """Deterministic init matching the PyTorch module:
    xavier_uniform_ on weight (1, width), zeros on bias (1,)."""
    fan_in, fan_out = width, 1
    bound = float(np.sqrt(6.0 / (fan_in + fan_out)))
    weight = jax.random.uniform(
        key, (1, width), minval=-bound, maxval=bound, dtype=jnp.float32
    )
    bias = jnp.zeros((1,), dtype=jnp.float32)
    return weight, bias


if __name__ == "__main__":
    key = jax.random.PRNGKey(0)
    k_x, k_w = jax.random.split(key)

    batch, width = 8, 32
    x = jax.random.normal(k_x, (batch, width), dtype=jnp.float32)
    weight, bias = init_params(width, k_w)

    out = linear_model_forward(x, weight, bias)
    out = jax.block_until_ready(out)

    # Reference check in plain JAX (same semantics as nn.Linear forward).
    ref = x @ weight.T + bias
    np.testing.assert_allclose(np.asarray(out), np.asarray(ref), rtol=1e-5, atol=1e-5)

    # Also exercise a batch that is not a multiple of 8 (ragged last block).
    batch2 = 300
    x2 = jax.random.normal(jax.random.PRNGKey(1), (batch2, width), dtype=jnp.float32)
    out2 = jax.block_until_ready(linear_model_forward(x2, weight, bias))
    ref2 = x2 @ weight.T + bias
    np.testing.assert_allclose(np.asarray(out2), np.asarray(ref2), rtol=1e-5, atol=1e-5)

    print("KERNEL_OK")
</pallas_src>

<mosaic_0001>
module attributes {stable_mosaic.version = 11 : i64} {
  func.func @_linear_kernel(%arg0: i32, %arg1: memref<1xf32, #tpu.memory_space<smem>>, %arg2: memref<8x32xf32, #tpu.memory_space<vmem>>, %arg3: memref<1x32xf32, #tpu.memory_space<vmem>>, %arg4: memref<1x1x8xf32, #tpu.memory_space<vmem>>) attributes {dimension_semantics = [#tpu.dimension_semantics<parallel>], iteration_bounds = array<i64: 1>, scalar_prefetch = 1 : i64, scratch_operands = 0 : i64, tpu.core_type = #tpu.core_type<tc>, window_params = [{transform_indices = @transform_0, window_bounds = array<i64: 8, 32>}, {pipeline_mode = #tpu.pipeline_mode<synchronous>, transform_indices = @transform_1, window_bounds = array<i64: 1, 32>}, {transform_indices = @transform_2, window_bounds = array<i64: 1, 1, 8>}]} {
    %c0 = arith.constant 0 : index
    %c0_0 = arith.constant 0 : index
    %0 = vector.load %arg2[%c0, %c0_0] : memref<8x32xf32, #tpu.memory_space<vmem>>, vector<8x32xf32>
    %c0_1 = arith.constant 0 : index
    %c0_2 = arith.constant 0 : index
    %1 = vector.load %arg3[%c0_1, %c0_2] : memref<1x32xf32, #tpu.memory_space<vmem>>, vector<1x32xf32>
    %2 = vector.broadcast %1 : vector<1x32xf32> to vector<8x32xf32>
    %3 = arith.mulf %0, %2 : vector<8x32xf32>
    %cst = arith.constant dense<0.000000e+00> : vector<8xf32>
    %4 = vector.multi_reduction <add>, %3, %cst [1] : vector<8x32xf32> to vector<8xf32>
    %c0_3 = arith.constant 0 : index
    %5 = memref.load %arg1[%c0_3] : memref<1xf32, #tpu.memory_space<smem>>
    %6 = vector.broadcast %5 : f32 to vector<8xf32>
    %7 = arith.addf %4, %6 : vector<8xf32>
    %c0_4 = arith.constant 0 : index
    %c0_5 = arith.constant 0 : index
    %c0_6 = arith.constant 0 : index
    %8 = vector.load %arg4[%c0_4, %c0_5, %c0_6] : memref<1x1x8xf32, #tpu.memory_space<vmem>>, vector<1x1x8xf32>
    %9 = vector.shape_cast %8 : vector<1x1x8xf32> to vector<8xf32>
    %10 = vector.shape_cast %7 : vector<8xf32> to vector<1x1x8xf32>
    tpu.vector_store %arg4[%c0_4, %c0_5, %c0_6], %10 {strides = array<i32>} : memref<1x1x8xf32, #tpu.memory_space<vmem>>, vector<1x1x8xf32>,
    return
  }
  func.func @transform_0(%arg0: i32, %arg1: memref<1xf32, #tpu.memory_space<smem>>) -> (i32, i32) {
    %c0_i32 = arith.constant 0 : i32
    %c0_i32_0 = arith.constant 0 : i32
    return %arg0, %c0_i32 : i32, i32
  }
  func.func @transform_1(%arg0: i32, %arg1: memref<1xf32, #tpu.memory_space<smem>>) -> (i32, i32) {
    %c0_i32 = arith.constant 0 : i32
    %c0_i32_0 = arith.constant 0 : i32
    %c0_i32_1 = arith.constant 0 : i32
    return %c0_i32, %c0_i32_0 : i32, i32
  }
  func.func @transform_2(%arg0: i32, %arg1: memref<1xf32, #tpu.memory_space<smem>>) -> (i32, i32, i32) {
    %c0_i32 = arith.constant 0 : i32
    %c0_i32_0 = arith.constant 0 : i32
    %c0_i32_1 = arith.constant 0 : i32
    return %arg0, %c0_i32, %c0_i32_0 : i32, i32, i32
  }
}

</mosaic_0001>

<bundles_post_ra>
// kernel: tpu_custom_call.1
= control target key start
LH: loop header
LB: loop body
LE: loop exit
PB: predicated region body
PF: predicated region fallthrough
CT: control target
= control target key end

     0   :  { %9 = vsyncpa [#allocation5], 0  ;;  %s170_s0 = inlined_call_operand.<no memory space> [shape: f32[1], index: 0, kind: input, shape index: {}]   ;;  %s171_s1 = inlined_call_operand.hbm [shape: f32[8,32], index: 1, kind: input, shape index: {}]   ;;  %s172_s2 = inlined_call_operand.vmem [shape: f32[1,32], index: 2, kind: input, shape index: {}]   ;;  %s173_s3 = inlined_call_operand.hbm [shape: f32[1,1,8], index: 3, kind: output, shape index: {}]  }
   0x1   :  { %10 = vsyncpa [#allocation6], 0  ;;  %s118_s12 = smov [#allocation4]   ;;  %s70_s16 = scalar_lea.hbm %s171_s1, 128 }
   0x2   :  { %s17_s13 = sshll.u32 %s118_s12, 4  ;;  %p71_p0 = scmp.ne.s32.totalorder %s171_s1, %s70_s16  ;;  %s18_s13 = int_to_ptr.vmem [resolvable:$true] %s17_s13 }
   0x3   :  { %p74_p1 = scmp.lt.u32.totalorder %s70_s16, %s171_s1 }
   0x5   :  { %p76_p2 = pnand %p74_p1, %p71_p0 }
   0x7   :  { %79 = shalt.err (!%p76_p2)
}
   0x8   :  { %s80_s21 = scalar_lea.vmem %s18_s13, 128  ;;  %p85_p4 = scmp.lt.s32.totalorder %s18_s13, %s18_s13 }
   0x9   :  { %p81_p3 = scmp.ne.s32.totalorder %s18_s13, %s80_s21  ;;  %p86_p5 = scmp.lt.s32.totalorder %s80_s21, %s80_s21 }
   0xb   :  { %p87_p6 = por %p86_p5, %p85_p4 }
   0xd   :  { %p88_p7 = pnand %p87_p6, %p81_p3 }
   0xf   :  { %91 = shalt.err (!%p88_p7)
}
  0x10   :  { %20 = dma.hbm_to_vmem [thread:$0]  %s171_s1, 128, %s18_s13, [#allocation5]  }
  0x11   :  { %114 = dma.done.wait [#allocation5], 128  }
  0x12   :  { %115 = vsyncadd [#allocation5], 4294967168  ;;  %v26_v0 = vld [vmem:[#allocation4] sm:$0xff]  ;;  %vm35_vm0 = vcmask 261120   ;;  %v43_v4 = vlaneseq  ;;  %v40_v7 = vstv %s170_s0  ;;  %s119_s1 = smov [#allocation7]   ;;  %vm50_vm1 = vcmask 57344  }
  0x13   :  { %v67_v1 = vld [vmem:[%s172_s2] ss:$0 sm:$0xff]  ;;  %s58_s28 = sshll.u32 %s119_s1, 4  ;;  %s59_s28 = int_to_ptr.vmem [resolvable:$true] %s58_s28 }
  0x14   :  { %v34_v2 = vmul.f32 %v67_v1, %v26_v0  ;;  %v44_v5 = vand.u32 127, %v43_v4  ;;  %v46_v6 = vshrl.u32 %v43_v4, 7  ;;  %s92_s2 = scalar_lea.vmem %s59_s28, 16  ;;  %s96_s29 = scalar_lea.vmem %s59_s28, 32 }
  0x15   :  { %p93_p8 = scmp.ne.s32.totalorder %s59_s28, %s92_s2  ;;  %p97_p9 = scmp.lt.s32.totalorder %s59_s28, %s59_s28 }
  0x16   :  { %v36_v3 = vsel %vm35_vm0, %v34_v2, 0.0  ;;  %v47_v8 = vsub.s32 %v44_v5, %v46_v6  ;;  %p98_p10 = scmp.lt.s32.totalorder %s96_s29, %s92_s2 }
  0x17   :  { %37 = vadd.xlane.f32.xlu0 %v36_v3 }
  0x18   :  { %p99_p11 = por %p98_p10, %p97_p9 }
  0x1a   :  { %p100_p12 = pnand %p99_p11, %p93_p8 }
  0xa4   :  { %v38_v9 = vpop.xlane.xlu0 %37 }
  0xa5   :  { %v41_v10 = vadd.f32 %v40_v7, %v38_v9 }
  0xa7   :  { %v48_v11 = vrot.slane %v41_v10, %v47_v8 }
  0xa9   :  { %51 = vst.msk [vmem:[#allocation7] sm:$0x1] %vm50_vm1, %v48_v11 }
  0xaa   :  { %103 = shalt.err (!%p100_p12)
}
  0xab   :  { %s104_s0 = scalar_lea.hbm %s173_s3, 16 }
  0xac   :  { %p105_p13 = scmp.ne.s32.totalorder %s173_s3, %s104_s0  ;;  %p108_p0 = scmp.lt.u32.totalorder %s104_s0, %s173_s3 }
  0xae   :  { %p110_p1 = pnand %p108_p0, %p105_p13 }
  0xb0   :  { %113 = shalt.err (!%p110_p1)
}
  0xb1   :  { %61 = dma.vmem_to_hbm [thread:$0]  %s59_s28, 16, %s173_s3, [#allocation6]  }
  0xb2   :  { %116 = dma.done.wait [#allocation6], 16  }
  0xb3   :  { %117 = vsyncadd [#allocation6], 4294967280 }
  0xb4   :  { %65 = vsyncpa [#allocation5], 1 }
  0xb5   :  { %66 = vsyncpa [#allocation6], 1 }

</bundles_post_ra>
